<compile_context>
chip_gen: v7x
topology: tpu7x:2x2x1
jax: 0.10.0
libtpu: 0.0.40
codegen_flags: <defaults>
</compile_context>

<pallas_src>
import functools

import jax
import jax.numpy as jnp
from jax.experimental import pallas as pl
from jax.experimental.pallas import tpu as pltpu


def _kd_loss_kernel(logits_ref, target_ref, o_ref, *,
                    temperature, ratio, batch, block_rows):
    """One (TB, Cpad) batch tile. logits_ref: (2, TB, Cpad); target_ref: (TB, 1)."""
    inv_t = 1.0 / float(temperature)
    inv_b = 1.0 / float(batch)

    t = logits_ref[0].astype(jnp.float32)          # teacher logits (TB, Cpad)
    s = logits_ref[1].astype(jnp.float32)          # student logits (TB, Cpad)
    tb, c_pad = s.shape

    # ---- teacher soft labels at temperature T (per-row EUP reciprocal, no divides)
    t = t * inv_t
    t_max = jnp.max(t, axis=1, keepdims=True)
    t_exp = jnp.exp(t - t_max)
    t_soft = t_exp * pl.reciprocal(jnp.sum(t_exp, axis=1, keepdims=True), approx=True)

    # ---- shared student shift: max(s/T) == max(s)/T for T > 0, so compute max once
    s_max = jnp.max(s, axis=1, keepdims=True)
    s_shift = s - s_max                             # (TB, Cpad)
    st_shift = s_shift * inv_t                      # (TB, Cpad)

    # ---- distillation CE, fused: -sum_c t_soft*(st_shift - st_lse) = st_lse - sum(t_soft*st_shift)
    st_lse = jnp.log(jnp.sum(jnp.exp(st_shift), axis=1, keepdims=True))      # (TB, 1)
    dist = st_lse - jnp.sum(t_soft * st_shift, axis=1, keepdims=True)        # (TB, 1)

    # ---- hard-label CE via iota==target mask (no one-hot matrix input)
    s_lse = jnp.log(jnp.sum(jnp.exp(s_shift), axis=1, keepdims=True))        # (TB, 1)
    col = jax.lax.broadcasted_iota(jnp.int32, (tb, c_pad), 1)
    tgt = target_ref[...]                                                    # (TB, 1) int32
    picked = jnp.sum(jnp.where(col == tgt, s_shift, 0.0), axis=1, keepdims=True)
    ce = s_lse - picked                                                      # (TB, 1)

    # ---- mask padded batch rows, reduce to this tile's partial loss (uses global B)
    row = jax.lax.broadcasted_iota(jnp.int32, (tb, 1), 0) + pl.program_id(0) * block_rows
    valid = (row < batch).astype(jnp.float32)
    contrib = inv_b * jnp.sum(valid * (ratio * dist + (1.0 - ratio) * ce))

    # Lane-dense partial output block; wrapper sums element [0, 0] of each tile.
    o_ref[...] = jnp.broadcast_to(contrib, o_ref.shape)


@functools.partial(jax.jit,
                   static_argnames=("temperature", "distillation_loss_ratio",
                                    "block_rows"))
def offline_kd_loss(outputs, target, *, temperature,
                    distillation_loss_ratio=0.5, block_rows=256):
    """outputs: (2, B, C) float (teacher, student), target: (B,) int -> scalar f32."""
    if outputs.shape[0] != 2:
        raise ValueError("offline distillation must have 2 logits")
    B, C = outputs.shape[1], outputs.shape[2]

    # Lane-dense class tile (multiple of 128) and sublane-aligned batch tile.
    c_pad = max(128, ((C + 127) // 128) * 128)
    tb = min(int(block_rows), ((B + 7) // 8) * 8)
    tb = ((tb + 7) // 8) * 8
    b_pad = ((B + tb - 1) // tb) * tb
    num_tiles = b_pad // tb

    # Pad with a large negative so padded class columns vanish from every softmax.
    # (Padded rows become uniform rows and are zeroed by the in-kernel row mask.)
    if (b_pad != B) or (c_pad != C):
        outputs_p = jnp.pad(outputs, ((0, 0), (0, b_pad - B), (0, c_pad - C)),
                            constant_values=-1e30)
    else:
        outputs_p = outputs

    tgt = target.astype(jnp.int32)
    if b_pad != B:
        tgt = jnp.pad(tgt, (0, b_pad - B))
    tgt = tgt.reshape(b_pad, 1)

    kernel = functools.partial(
        _kd_loss_kernel,
        temperature=float(temperature),
        ratio=float(distillation_loss_ratio),
        batch=B,
        block_rows=tb,
    )

    itemsize = jnp.dtype(outputs_p.dtype).itemsize
    tile_bytes = 2 * tb * c_pad * itemsize           # one (2, TB, Cpad) logits block
    vmem_limit = int(min(64 * 1024 * 1024,
                         max(32 * 1024 * 1024, 8 * tile_bytes)))

    cost = pl.CostEstimate(
        flops=12 * b_pad * c_pad,
        transcendentals=3 * b_pad * c_pad + 3 * b_pad,   # 3 exps/elem + 2 logs + 1 rcp per row
        bytes_accessed=2 * b_pad * c_pad * itemsize + b_pad * 4 + num_tiles * 8 * 128 * 4,
    )

    partials = pl.pallas_call(
        kernel,
        out_shape=jax.ShapeDtypeStruct((num_tiles, 8, 128), jnp.float32),
        grid=(num_tiles,),
        in_specs=[
            # one block covers teacher AND student rows of this batch tile
            pl.BlockSpec((2, tb, c_pad), lambda i: (0, i, 0)),
            pl.BlockSpec((tb, 1), lambda i: (i, 0)),
        ],
        out_specs=pl.BlockSpec((1, 8, 128), lambda i: (i, 0, 0)),
        compiler_params=pltpu.CompilerParams(
            dimension_semantics=("parallel",),
            vmem_limit_bytes=vmem_limit,
        ),
        cost_estimate=cost,
    )(outputs_p, tgt)

    return jnp.sum(partials[:, 0, 0])


def _reference_kd_loss(outputs, target, *, temperature, distillation_loss_ratio=0.5):
    """Pure-JAX reference mirroring the PyTorch module."""
    teacher, student = outputs[0].astype(jnp.float32), outputs[1].astype(jnp.float32)
    soft_labels = jax.nn.softmax(teacher / temperature, axis=1)
    soft_preds = jax.nn.softmax(student / temperature, axis=1)
    dist = jnp.mean(-jnp.sum(soft_labels * jnp.log(soft_preds), axis=1))
    logp = jax.nn.log_softmax(student, axis=1)
    ce = jnp.mean(-jnp.take_along_axis(logp, target[:, None], axis=1)[:, 0])
    return distillation_loss_ratio * dist + (1.0 - distillation_loss_ratio) * ce


if __name__ == "__main__":
    key = jax.random.PRNGKey(0)
    k1, k2, k3 = jax.random.split(key, 3)

    B, C = 8, 32
    TEMPERATURE = 4.0
    RATIO = 0.5

    teacher_logits = jax.random.normal(k1, (B, C), dtype=jnp.float32) * 2.0
    student_logits = jax.random.normal(k2, (B, C), dtype=jnp.float32) * 2.0
    outputs = jnp.stack([teacher_logits, student_logits], axis=0)  # (2, B, C)
    target = jax.random.randint(k3, (B,), 0, C, dtype=jnp.int32)

    loss = offline_kd_loss(
        outputs, target, temperature=TEMPERATURE, distillation_loss_ratio=RATIO
    )
    loss = jax.block_until_ready(loss)

    ref = _reference_kd_loss(
        outputs, target, temperature=TEMPERATURE, distillation_loss_ratio=RATIO
    )
    # tolerance accounts for pl.reciprocal(approx=True) in the teacher softmax
    assert jnp.allclose(loss, ref, rtol=5e-3, atol=5e-3), (loss, ref)

    print("KERNEL_OK")
</pallas_src>

<mosaic_0001>
module attributes {stable_mosaic.version = 11 : i64} {
  func.func @_kd_loss_kernel(%arg0: i32, %arg1: memref<2x8x128xf32, #tpu.memory_space<vmem>>, %arg2: memref<8x1xi32, #tpu.memory_space<vmem>>, %arg3: memref<1x8x128xf32, #tpu.memory_space<vmem>>) attributes {dimension_semantics = [#tpu.dimension_semantics<parallel>], iteration_bounds = array<i64: 1>, scalar_prefetch = 0 : i64, scratch_operands = 0 : i64, tpu.core_type = #tpu.core_type<tc>, window_params = [{transform_indices = @transform_0, window_bounds = array<i64: 2, 8, 128>}, {transform_indices = @transform_1, window_bounds = array<i64: 8, 1>}, {transform_indices = @transform_2, window_bounds = array<i64: 1, 8, 128>}]} {
    %c0 = arith.constant 0 : index
    %c0_0 = arith.constant 0 : index
    %c0_1 = arith.constant 0 : index
    %0 = vector.load %arg1[%c0, %c0_0, %c0_1] : memref<2x8x128xf32, #tpu.memory_space<vmem>>, vector<1x8x128xf32>
    %1 = vector.shape_cast %0 : vector<1x8x128xf32> to vector<8x128xf32>
    %c1 = arith.constant 1 : index
    %c0_2 = arith.constant 0 : index
    %c0_3 = arith.constant 0 : index
    %2 = vector.load %arg1[%c1, %c0_2, %c0_3] : memref<2x8x128xf32, #tpu.memory_space<vmem>>, vector<1x8x128xf32>
    %3 = vector.shape_cast %2 : vector<1x8x128xf32> to vector<8x128xf32>
    %cst = arith.constant 2.500000e-01 : f32
    %4 = vector.broadcast %cst : f32 to vector<8x128xf32>
    %5 = arith.mulf %1, %4 : vector<8x128xf32>
    %cst_4 = arith.constant dense<0xFF800000> : vector<8xf32>
    %6 = vector.multi_reduction <maximumf>, %5, %cst_4 [1] : vector<8x128xf32> to vector<8xf32>
    %7 = vector.shape_cast %6 : vector<8xf32> to vector<8x1xf32>
    %8 = vector.broadcast %7 : vector<8x1xf32> to vector<8x128xf32>
    %9 = arith.subf %5, %8 : vector<8x128xf32>
    %10 = math.exp %9 : vector<8x128xf32>
    %cst_5 = arith.constant dense<0.000000e+00> : vector<8xf32>
    %11 = vector.multi_reduction <add>, %10, %cst_5 [1] : vector<8x128xf32> to vector<8xf32>
    %12 = vector.shape_cast %11 : vector<8xf32> to vector<8x1xf32>
    %13 = tpu.reciprocal %12 {approx = true} : vector<8x1xf32> -> vector<8x1xf32>
    %14 = vector.broadcast %13 : vector<8x1xf32> to vector<8x128xf32>
    %15 = arith.mulf %10, %14 : vector<8x128xf32>
    %cst_6 = arith.constant dense<0xFF800000> : vector<8xf32>
    %16 = vector.multi_reduction <maximumf>, %3, %cst_6 [1] : vector<8x128xf32> to vector<8xf32>
    %17 = vector.shape_cast %16 : vector<8xf32> to vector<8x1xf32>
    %18 = vector.broadcast %17 : vector<8x1xf32> to vector<8x128xf32>
    %19 = arith.subf %3, %18 : vector<8x128xf32>
    %cst_7 = arith.constant 2.500000e-01 : f32
    %20 = vector.broadcast %cst_7 : f32 to vector<8x128xf32>
    %21 = arith.mulf %19, %20 : vector<8x128xf32>
    %22 = math.exp %21 : vector<8x128xf32>
    %cst_8 = arith.constant dense<0.000000e+00> : vector<8xf32>
    %23 = vector.multi_reduction <add>, %22, %cst_8 [1] : vector<8x128xf32> to vector<8xf32>
    %24 = vector.shape_cast %23 : vector<8xf32> to vector<8x1xf32>
    %25 = math.log %24 : vector<8x1xf32>
    %26 = arith.mulf %15, %21 : vector<8x128xf32>
    %cst_9 = arith.constant dense<0.000000e+00> : vector<8xf32>
    %27 = vector.multi_reduction <add>, %26, %cst_9 [1] : vector<8x128xf32> to vector<8xf32>
    %28 = vector.shape_cast %27 : vector<8xf32> to vector<8x1xf32>
    %29 = arith.subf %25, %28 : vector<8x1xf32>
    %30 = math.exp %19 : vector<8x128xf32>
    %cst_10 = arith.constant dense<0.000000e+00> : vector<8xf32>
    %31 = vector.multi_reduction <add>, %30, %cst_10 [1] : vector<8x128xf32> to vector<8xf32>
    %32 = vector.shape_cast %31 : vector<8xf32> to vector<8x1xf32>
    %33 = math.log %32 : vector<8x1xf32>
    %34 = tpu.iota {dimensions = array<i32: 1>} : vector<8x128xi32>
    %c0_11 = arith.constant 0 : index
    %c0_12 = arith.constant 0 : index
    %35 = vector.load %arg2[%c0_11, %c0_12] : memref<8x1xi32, #tpu.memory_space<vmem>>, vector<8x1xi32>
    %36 = vector.broadcast %35 : vector<8x1xi32> to vector<8x128xi32>
    %37 = arith.cmpi eq, %34, %36 : vector<8x128xi32>
    %cst_13 = arith.constant 0.000000e+00 : f32
    %38 = vector.broadcast %cst_13 : f32 to vector<8x128xf32>
    %39 = arith.select %37, %19, %38 : vector<8x128xi1>, vector<8x128xf32>
    %cst_14 = arith.constant dense<0.000000e+00> : vector<8xf32>
    %40 = vector.multi_reduction <add>, %39, %cst_14 [1] : vector<8x128xf32> to vector<8xf32>
    %41 = vector.shape_cast %40 : vector<8xf32> to vector<8x1xf32>
    %42 = arith.subf %33, %41 : vector<8x1xf32>
    %43 = tpu.iota {dimensions = array<i32: 0>} : vector<8x1xi32>
    %c8_i32 = arith.constant 8 : i32
    %44 = arith.muli %arg0, %c8_i32 : i32
    %45 = vector.broadcast %44 : i32 to vector<8x1xi32>
    %46 = arith.addi %43, %45 : vector<8x1xi32>
    %c8_i32_15 = arith.constant 8 : i32
    %47 = vector.broadcast %c8_i32_15 : i32 to vector<8x1xi32>
    %48 = arith.cmpi slt, %46, %47 : vector<8x1xi32>
    %49 = arith.extui %48 : vector<8x1xi1> to vector<8x1xi32>
    %50 = arith.sitofp %49 : vector<8x1xi32> to vector<8x1xf32>
    %cst_16 = arith.constant 5.000000e-01 : f32
    %51 = vector.broadcast %cst_16 : f32 to vector<8x1xf32>
    %52 = arith.mulf %51, %29 : vector<8x1xf32>
    %cst_17 = arith.constant 5.000000e-01 : f32
    %53 = vector.broadcast %cst_17 : f32 to vector<8x1xf32>
    %54 = arith.mulf %53, %42 : vector<8x1xf32>
    %55 = arith.addf %52, %54 : vector<8x1xf32>
    %56 = arith.mulf %50, %55 : vector<8x1xf32>
    %57 = vector.shape_cast %56 : vector<8x1xf32> to vector<1x8x1xf32>
    %cst_18 = arith.constant dense<0.000000e+00> : vector<1xf32>
    %58 = vector.multi_reduction <add>, %57, %cst_18 [1, 2] : vector<1x8x1xf32> to vector<1xf32>
    %59 = vector.shape_cast %58 : vector<1xf32> to vector<1x1x1xf32>
    %60 = vector.extract %59[0, 0, 0] : f32 from vector<1x1x1xf32>
    %cst_19 = arith.constant 1.250000e-01 : f32
    %61 = arith.mulf %cst_19, %60 : f32
    %62 = vector.broadcast %61 : f32 to vector<1x8x128xf32>
    %c0_20 = arith.constant 0 : index
    %c0_21 = arith.constant 0 : index
    %c0_22 = arith.constant 0 : index
    %63 = vector.load %arg3[%c0_20, %c0_21, %c0_22] : memref<1x8x128xf32, #tpu.memory_space<vmem>>, vector<1x8x128xf32>
    tpu.vector_store %arg3[%c0_20, %c0_21, %c0_22], %62 {strides = array<i32>} : memref<1x8x128xf32, #tpu.memory_space<vmem>>, vector<1x8x128xf32>,
    return
  }
  func.func @transform_0(%arg0: i32) -> (i32, i32, i32) {
    %c0_i32 = arith.constant 0 : i32
    %c0_i32_0 = arith.constant 0 : i32
    %c0_i32_1 = arith.constant 0 : i32
    return %c0_i32, %arg0, %c0_i32_0 : i32, i32, i32
  }
  func.func @transform_1(%arg0: i32) -> (i32, i32) {
    %c0_i32 = arith.constant 0 : i32
    %c0_i32_0 = arith.constant 0 : i32
    return %arg0, %c0_i32 : i32, i32
  }
  func.func @transform_2(%arg0: i32) -> (i32, i32, i32) {
    %c0_i32 = arith.constant 0 : i32
    %c0_i32_0 = arith.constant 0 : i32
    %c0_i32_1 = arith.constant 0 : i32
    return %arg0, %c0_i32, %c0_i32_0 : i32, i32, i32
  }
}

</mosaic_0001>

<bundles_post_ra>
// kernel: offline_kd_loss.1
= control target key start
LH: loop header
LB: loop body
LE: loop exit
PB: predicated region body
PF: predicated region fallthrough
CT: control target
= control target key end

     0   :  { %v103_v3 = vmov 0   ;;  %v44_v17 = vlaneseq  ;;  %vm67_vm1 = vcmask 7168   ;;  %s131_s0 = inlined_call_operand.vmem [shape: f32[2,8,128], index: 0, kind: input, shape index: {}]   ;;  %s132_s1 = inlined_call_operand.vmem [shape: s32[8,1], index: 1, kind: input, shape index: {}]   ;;  %s133_s2 = inlined_call_operand.vmem [shape: f32[1,8,128], index: 2, kind: output, shape index: {}]  }
   0x1   :  { %v11_v0 = vld [vmem:[%s131_s0] sm:$0xff]  ;;  %v85_v2 = vld [vmem:[%s131_s0 + $0x8] sm:$0xff]  ;;  %89 = vset.pattern.permute.xlu1 %v103_v3  ;;  %90 = vset.pattern.permute.xlu0 %v103_v3 }
   0x2   :  { %v14_v1 = vmul.f32 0.25, %v11_v0  ;;  %v46_v15 = vld [vmem:[%s132_s1] sm:$0xff]  ;;  %v45_v19 = vand.u32 127, %v44_v17 }
   0x4   :  { %15 = vmax.xlane.f32.xlu0 %v14_v1 }
   0x8   :  { %24 = vmax.xlane.f32.xlu0 %v85_v2 }
  0x91   :  { %v16_v4 = vpop.xlane.xlu0 %15 }
  0x92   :  { %v17_v5 = vsub.f32 %v14_v1, %v16_v4 }
  0x94   :  { %v18_v6 = vmul.f32 1.442695, %v17_v5 }
  0x95   :  { %v25_v7 = vpop.xlane.xlu0 %24 }
  0x96   :  { %91 = vpow2.f32 %v18_v6  ;;  %v26_v8 = vsub.f32 %v85_v2, %v25_v7 }
  0x98   :  { %v27_v9 = vmul.f32 0.25, %v26_v8  ;;  %v38_v11 = vmul.f32 1.442695, %v26_v8 }
  0x9a   :  { %v28_v10 = vmul.f32 1.442695, %v27_v9 }
  0x9c   :  { %93 = vpow2.f32 %v28_v10 }
  0x9d   :  { %95 = vpow2.f32 %v38_v11 }
  0xa0   :  { %v92_v12 = vpop.eup %91 }
  0xa1   :  { %20 = vadd.xlane.f32.xlu1 %v92_v12 }
  0xa6   :  { %v94_v13 = vpop.eup %93 }
  0xa7   :  { %30 = vadd.xlane.f32.xlu0 %v94_v13  ;;  %v96_v14 = vpop.eup %95 }
  0xab   :  { %40 = vadd.xlane.f32.xlu0 %v96_v14 }
  0xb2   :  { %48 = vperm.xlu1 %89, %v46_v15  }
 0x12e   :  { %v21_v16 = vpop.xlane.xlu1 %20 }
 0x12f   :  { %97 = vrcp.f32 %v21_v16 }
 0x132   :  { %v49_v21 = vpop.permute.xlu1 %48 }
 0x133   :  { %vm50_vm0 = vcmp.eq.s32.totalorder %v45_v19, %v49_v21 }
 0x134   :  { %v51_v23 = vsel %vm50_vm0, %v26_v8, 0.0  ;;  %v31_v24 = vpop.xlane.xlu0 %30 }
 0x135   :  { %99 = vlog2.f32 %v31_v24 }
 0x138   :  { %v41_v25 = vpop.xlane.xlu0 %40 }
 0x139   :  { %v98_v18 = vpop.eup %97  ;;  %101 = vlog2.f32 %v41_v25 }
 0x13a   :  { %v23_v20 = vmul.f32 %v98_v18, %v92_v12 }
 0x13c   :  { %v34_v22 = vmul.f32 %v27_v9, %v23_v20 }
 0x13e   :  { %35 = vadd.xlane.f32.xlu0 %v34_v22 }
 0x13f   :  { %v100_v26 = vpop.eup %99 }
 0x140   :  { %v33_v27 = vmul.f32 0.6931472, %v100_v26 }
 0x142   :  { %52 = vadd.xlane.f32.xlu0 %v51_v23 }
 0x143   :  { %v102_v28 = vpop.eup %101 }
 0x144   :  { %v43_v31 = vmul.f32 0.6931472, %v102_v28 }
 0x1cb   :  { %v36_v29 = vpop.xlane.xlu0 %35 }
 0x1cc   :  { %v37_v30 = vsub.f32 %v33_v27, %v36_v29 }
 0x1ce   :  { %v63_v34 = vmul.f32 0.5, %v37_v30 }
 0x1cf   :  { %v53_v32 = vpop.xlane.xlu0 %52 }
 0x1d0   :  { %v54_v33 = vsub.f32 %v43_v31, %v53_v32 }
 0x1d2   :  { %v64_v35 = vmul.f32 0.5, %v54_v33 }
 0x1d4   :  { %v65_v36 = vadd.f32 %v64_v35, %v63_v34 }
 0x1d6   :  { %v68_v37 = vsel %vm67_vm1, %v65_v36, 0.0 }
 0x1d7   :  { %69 = vadd.xlane.f32.xlu1 %v68_v37 }
 0x264   :  { %v70_v38 = vpop.xlane.xlu1 %69 }
 0x265   :  { %v71_v39 = vrot.slane %v70_v38, 4 }
 0x267   :  { %v72_v40 = vadd.f32 %v71_v39, %v70_v38 }
 0x269   :  { %v73_v41 = vrot.slane %v72_v40, 2 }
 0x26b   :  { %v74_v42 = vadd.f32 %v73_v41, %v72_v40 }
 0x26d   :  { %v75_v43 = vrot.slane %v74_v42, 1 }
 0x26f   :  { %v76_v44 = vadd.f32 %v75_v43, %v74_v42 }
 0x271   :  { %86 = vpush %v76_v44 }
 0x2a2   :  { %s87_s1 = spop %86 }
 0x2a3   :  { %s78_s14 = smul.f32 0.125, %s87_s1 }
 0x2a5   :  { %v79_v45 = vstv %s78_s14 }
 0x2a6   :  { %80 = vst [vmem:[%s133_s2] sm:$0xff] %v79_v45 }

</bundles_post_ra>
